<compile_context>
chip_gen: v6e
topology: v6e:2x2x1
jax: 0.10.0
libtpu: 0.0.40
codegen_flags: <defaults>
</compile_context>

<pallas_src>
import functools
import math

import jax
import jax.numpy as jnp
from jax.experimental import pallas as pl


# ----------------------------------------------------------------------------
# Config (stand-in for read_yaml(config.yaml)[dataset_name])
# TODO(synk): config.yaml is external; values are hard-coded deterministically.
ARGS = dict(
    init_method="normal",
    norm=10.0,
    resample_size=4,
    coef_scale_nec=1.0,
    coef_scale_suf=1.0,
    perturb_size=4,
    scale=1.0,
)

KP = 128  # classifier output lanes after zero-padding (lane-dense stores/MXU)


# ----------------------------------------------------------------------------
# In-kernel helpers
def _argmax_onehot(logits, num_classes):
    """One-hot of argmax over the first `num_classes` lanes of padded logits.

    Uses max + first-index-of-max built from lane-wise f32 reductions only
    (matches torch.argmax first-index tie-breaking).
    Returns (onehot (rows, KP) f32, valid-lane mask (rows, KP) bool).
    """
    kp = logits.shape[-1]
    lane_i = jax.lax.broadcasted_iota(jnp.int32, logits.shape, 1)
    lane_f = lane_i.astype(jnp.float32)
    valid = lane_i < num_classes
    lm = jnp.where(valid, logits, -1e30)
    m = jnp.max(lm, axis=-1, keepdims=True)
    idx = jnp.min(jnp.where(lm >= m, lane_f, float(kp)), axis=-1, keepdims=True)
    onehot = (lane_f == idx).astype(jnp.float32)
    return onehot, valid


# ----------------------------------------------------------------------------
# Kernel #1: fused abduction stage.
#   selection + perturb + classifier (ONE matmul) + argmax/one-hot + psi + phi
#   + the full scalar abduction tail, for BOTH branches.
def _abduction_kernel(x_ref, tibw_ref, fm_ref, p_ref, w_ref, bic_ref,
                      stats_ref, head_ref, *,
                      num_classes, norm, coef_nec, coef_suf):
    x = x_ref[...]                                   # (N, D) f32
    tibw = tibw_ref[...]                             # (2, D): target, 1/bandwidth
    t = tibw[0:1, :]
    ibw = tibw[1:2, :]
    fm = fm_ref[...]                                 # (1, D)
    p = p_ref[...]                                   # (N, 1)  p_xj
    w = w_ref[...]                                   # (D, KP) bf16
    bic = bic_ref[...]                               # (2, KP): bias, 1/class_bw
    b = bic[0:1, :]
    icbw = bic[1:2, :]

    n, d = x.shape
    inv_d = 1.0 / float(d)

    # FeatureSelector (continuous Gaussian).  NEC uses fm, SUF uses (1 - fm).
    dd = (x - t) * ibw
    gauss = jnp.exp(-0.5 * dd * dd)                  # (N, D)
    sel_nec = gauss * fm
    sel_suf = gauss * (1.0 - fm)

    # psi indicator: mean over features of the masked Gaussian.
    c_nec = jnp.sum(sel_nec, axis=-1, keepdims=True) * inv_d    # (N, 1)
    c_suf = jnp.sum(sel_suf, axis=-1, keepdims=True) * inv_d

    # ONE merged MXU pass: rows [target (padded to 8) ; x*sel_nec ; x*sel_suf].
    row8 = jax.lax.broadcasted_iota(jnp.int32, (8, d), 0)
    grp0 = jnp.where(row8 == 0, t, 0.0)              # (8, D), row 0 = target
    lhs = jnp.concatenate([grp0, x * sel_nec, x * sel_suf], axis=0)
    logits = jnp.dot(lhs.astype(jnp.bfloat16), w,
                     preferred_element_type=jnp.float32) + b    # (8+2N, KP)

    onehot_all, valid = _argmax_onehot(logits, num_classes)
    clean_logits = logits[0:1, :]
    clean_onehot = onehot_all[0:1, :]

    # phi indicator: Gaussian kernel over one-hot class vectors.
    cd = (onehot_all - clean_onehot) * icbw
    g = jnp.where(valid, jnp.exp(-0.5 * cd * cd), 0.0)
    e_all = jnp.sum(g, axis=-1, keepdims=True) * (1.0 / float(num_classes))
    e_nec = e_all[8:8 + n, :]
    e_suf = 1.0 - e_all[8 + n:8 + 2 * n, :]
    rown = jax.lax.broadcasted_iota(jnp.int32, (n, 1), 0)
    e_suf = jnp.where(rown == 0, 1.0, e_suf)         # reference: e_suf[0] = 1

    # Abduction tail (scalar bookkeeping) done in-kernel.
    prob_ce_xj = c_nec * e_nec                       # (N, 1)
    prob_invce_xj = c_suf * e_suf
    weight_nec = prob_ce_xj * p                      # resampling weights
    weight_suf = prob_invce_xj * p

    logn = math.log(float(n))
    logv = -jnp.sum(jnp.log(ibw), axis=-1, keepdims=True)        # sum(log(bw))
    inv_norm = 1.0 / float(norm)
    pw_nec = jax.nn.sigmoid(
        (jnp.log(jnp.sum(c_nec, axis=0, keepdims=True)) - logn - logv) * inv_norm)
    pw_suf = jax.nn.sigmoid(
        (jnp.log(jnp.sum(c_suf, axis=0, keepdims=True)) - logn - logv) * inv_norm)
    prob_ce = jax.nn.sigmoid(jnp.sum(prob_ce_xj, axis=0, keepdims=True) * 100.0)
    prob_ce = jnp.where(prob_ce != 0.0, prob_ce, 1.0) * coef_nec
    # len(dataset) == len((x_batch, p_xj)) == 2 in the reference.
    prob_invce = (jnp.sum(prob_invce_xj, axis=0, keepdims=True) * 0.5) * coef_suf

    # Final loss scales (prediction_weight * prob) premultiplied here so the
    # prediction kernel only needs a full-lane row slice.
    scale_nec = pw_nec * prob_ce                     # (1, 1)
    scale_suf = pw_suf * prob_invce

    # Lane-dense per-sample output: resampling weights in lanes 0/1.
    lane_s = jax.lax.broadcasted_iota(jnp.int32, stats_ref.shape, 1)
    stats_ref[...] = jnp.where(lane_s == 0, weight_nec,
                     jnp.where(lane_s == 1, weight_suf, 0.0))

    # Head slab consumed directly by the prediction kernel.
    lane1 = jax.lax.broadcasted_iota(jnp.int32, (1, head_ref.shape[-1]), 1)
    scal = jnp.where(lane1 == 0, scale_nec,
           jnp.where(lane1 == 1, scale_suf, 0.0))
    rowh = jax.lax.broadcasted_iota(jnp.int32, head_ref.shape, 0)
    head_ref[...] = jnp.where(rowh == 0, clean_logits,
                    jnp.where(rowh == 1, clean_onehot,
                    jnp.where(rowh == 2, b,
                    jnp.where(rowh == 3, scal, 0.0))))


def fused_abduction_stage(x_flat, tibw, fm_flat, p_col, w_bf_pad, bic_pad, *,
                          num_classes, norm, coef_nec, coef_suf):
    n = x_flat.shape[0]
    kp = w_bf_pad.shape[1]
    return pl.pallas_call(
        functools.partial(_abduction_kernel, num_classes=num_classes,
                          norm=norm, coef_nec=coef_nec, coef_suf=coef_suf),
        out_shape=(jax.ShapeDtypeStruct((n, kp), jnp.float32),
                   jax.ShapeDtypeStruct((8, kp), jnp.float32)),
    )(x_flat, tibw, fm_flat, p_col, w_bf_pad, bic_pad)


# ----------------------------------------------------------------------------
# Kernel #2: fused prediction stage.  All (mask, sample) pairs of both branches
# in ONE matmul; losses weighted by the head-slab scales.
def _prediction_kernel(xstk_ref, m_ref, w_ref, head_ref, o_ref, *, num_classes):
    xstk = xstk_ref[...]             # (2R, D): rows 0..R-1 NEC samples, R..2R-1 SUF
    masks = m_ref[...]               # (P+1, D): rows 0..P-1 NEC masks, row P SUF mask
    w = w_ref[...]                   # (D, KP) bf16
    head = head_ref[...]             # (8, KP) from abduction kernel
    clean = head[0:1, :]
    onehot = head[1:2, :]
    b = head[2:3, :]
    scale = head[3:4, :]             # lane0 = pw_nec*prob_ce, lane1 = pw_suf*prob_invce

    two_r, d = xstk.shape
    r = two_r // 2
    num_p = masks.shape[0] - 1

    # Build ONE merged LHS from sublane-aligned (2R, D) blocks:
    #   block i (i<P): rows 0..R-1 = xn * mask_i   (rows R..2R-1 zeroed)
    #   block P      : rows R..2R-1 = xs * mask_suf (rows 0..R-1 zeroed)
    rowx = jax.lax.broadcasted_iota(jnp.int32, (two_r, d), 0)
    parts = [xstk * jnp.where(rowx < r, masks[i:i + 1, :], 0.0)
             for i in range(num_p)]
    parts.append(xstk * jnp.where(rowx >= r, masks[num_p:num_p + 1, :], 0.0))
    lhs = jnp.concatenate(parts, axis=0)                    # ((P+1)*2R, D)
    logits = jnp.dot(lhs.astype(jnp.bfloat16), w,
                     preferred_element_type=jnp.float32) + b

    total = (num_p + 1) * two_r
    row = jax.lax.broadcasted_iota(jnp.int32, (total, 1), 0)
    nec_valid = row < 0
    for i in range(num_p):
        lo = i * two_r
        nec_valid = nec_valid | ((row >= lo) & (row < lo + r))
    suf_valid = row >= num_p * two_r + r

    # NEC loss: sum_j mean_p exp(-||logits_{j,p} - clean||_2 / 100).
    diff = logits - clean                                    # padded lanes are 0
    dist = jnp.sqrt(jnp.sum(diff * diff, axis=-1, keepdims=True))
    loss_nec = jnp.sum(jnp.where(nec_valid, jnp.exp(-dist * 0.01), 0.0),
                       axis=0, keepdims=True) * (1.0 / float(num_p))

    # SUF loss (torch-literal semantics: target lane of (1-onehot)*logits is 0
    # and participates in the max; padded lanes are excluded).
    lane = jax.lax.broadcasted_iota(jnp.int32, logits.shape, 1)
    masked = jnp.where(lane < num_classes, (1.0 - onehot) * logits, -1e30)
    i_val = jnp.max(masked, axis=-1, keepdims=True)
    j_val = jnp.sum(logits * onehot, axis=-1, keepdims=True)
    raw = jnp.maximum(i_val - j_val, 0.0)
    loss_suf = jnp.sum(jnp.where(suf_valid, 1.0 - jnp.exp(-raw), 0.0),
                       axis=0, keepdims=True)

    # Lane-dense output row, already scaled by pred_weight * prob.
    lane_o = jax.lax.broadcasted_iota(jnp.int32, o_ref.shape, 1)
    loss_row = jnp.where(lane_o == 0, loss_nec,
               jnp.where(lane_o == 1, loss_suf, 0.0))
    o_ref[...] = loss_row * scale


def fused_prediction_stage(xstk, masks_flat, w_bf_pad, head, *, num_classes):
    kp = w_bf_pad.shape[1]
    return pl.pallas_call(
        functools.partial(_prediction_kernel, num_classes=num_classes),
        out_shape=jax.ShapeDtypeStruct((1, kp), jnp.float32),
    )(xstk, masks_flat, w_bf_pad, head)


# ----------------------------------------------------------------------------
# JAX glue reproducing the FANS control flow (stochastic / data-dependent bits)
def concrete_sample(key, log_alpha, temperature=1.0, bias=0.0, scale=1.0):
    # TODO(synk): concrete_sample is external; standard concrete relaxation
    # with deterministic PRNG key noise.
    eps = (1.0 - 2.0 * bias) * jax.random.uniform(key, log_alpha.shape) + bias
    eps = jnp.clip(eps, 1e-6, 1.0 - 1e-6)
    gate = jnp.log(eps) - jnp.log(1.0 - eps)
    gate = (gate + log_alpha * scale) / temperature
    return jax.nn.sigmoid(gate)


def resampling(key, x_flat, weights, resample_size):
    # TODO(synk): resampling is external/stochastic; deterministic weighted
    # sampling with a fixed PRNG key (data-dependent gather stays in JAX).
    w = jnp.maximum(weights, 0.0) + 1e-12
    p = w / jnp.sum(w)
    idx = jax.random.choice(key, x_flat.shape[0], shape=(resample_size,), p=p)
    return x_flat[idx]


def action_masks(key, feat_mask_param, args):
    """NEC: perturb_size concrete samples of (1 - mask); SUF: sigmoid(mask).
    Stacked into one (P+1, 1, W, H) array so kernel #2 gets a single input."""
    masks = []
    for i in range(int(args["perturb_size"])):
        k = jax.random.fold_in(key, i)
        mh = concrete_sample(k, feat_mask_param[None], temperature=1.0,
                             bias=0.0, scale=args["scale"])[0]
        masks.append(1.0 - mh)
    masks.append(jax.nn.sigmoid(feat_mask_param))
    return jnp.stack(masks)


def prepare_statics(target_x, feat_bandwidths, class_bandwidths, model_w,
                    model_b):
    """Hoisted once-per-model precompute (padded/cast classifier + target /
    1-over-bandwidth rows) so fans_forward never re-pads/casts per call."""
    _, C, W, H = target_x.shape
    D = C * W * H
    K = model_w.shape[1]
    assert K <= KP
    t_flat = target_x.reshape(1, D).astype(jnp.float32)
    inv_bw = (1.0 / feat_bandwidths).reshape(1, D).astype(jnp.float32)
    tibw = jnp.concatenate([t_flat, inv_bw], axis=0)                 # (2, D)
    w_pad = (jnp.zeros((D, KP), jnp.float32).at[:, :K].set(model_w)
             .astype(jnp.bfloat16))
    b_pad = jnp.zeros((1, KP), jnp.float32).at[:, :K].set(model_b.reshape(1, K))
    icbw = (jnp.ones((1, KP), jnp.float32)
            .at[:, :K].set((1.0 / class_bandwidths).reshape(1, K)))
    bic = jnp.concatenate([b_pad, icbw], axis=0)                     # (2, KP)
    return dict(tibw=tibw, w=w_pad, bic=bic, num_classes=K)


def fans_forward(key, sample_data, feat_mask_param, statics, args):
    # get_feat_mask ignores apply_sigmoid/mask_temp in the reference (raw param).
    x_batch, p_xj = sample_data
    N, C, W, H = x_batch.shape
    D = C * W * H
    K = statics["num_classes"]
    P = int(args["perturb_size"])
    R = int(args["resample_size"])
    # Sublane-aligned in-kernel row concatenation (f32 tile = 8 sublanes).
    assert N % 8 == 0 and (2 * R) % 8 == 0

    x_flat = x_batch.reshape(N, D).astype(jnp.float32)
    p_col = p_xj.reshape(N, 1).astype(jnp.float32)
    fm_flat = jnp.broadcast_to(feat_mask_param.reshape(1, 1, W, H),
                               (1, C, W, H)).reshape(1, D)

    # Fused kernel #1: selection + perturb + classifier + psi/phi + abduction
    # tail, both branches, one MXU matmul.
    stats, head = fused_abduction_stage(
        x_flat, statics["tibw"], fm_flat, p_col, statics["w"], statics["bic"],
        num_classes=K, norm=float(args["norm"]),
        coef_nec=float(args["coef_scale_nec"]),
        coef_suf=float(args["coef_scale_suf"]))

    k_nec, k_suf, k_act = jax.random.split(key, 3)
    samples_nec = resampling(k_nec, x_flat, stats[:, 0], R)          # (R, D)
    samples_suf = resampling(k_suf, x_flat, stats[:, 1], R)
    xstk = jnp.concatenate([samples_nec, samples_suf], axis=0)       # (2R, D)

    masks = action_masks(k_act, feat_mask_param, args)               # (P+1,1,W,H)
    masks_flat = jnp.broadcast_to(masks.reshape(P + 1, 1, W, H),
                                  (P + 1, C, W, H)).reshape(P + 1, D)

    # Fused kernel #2: both branch prediction losses, one MXU matmul, already
    # scaled by pred_weight_* and prob_ce / prob_invce (carried in `head`).
    out = fused_prediction_stage(xstk, masks_flat, statics["w"], head,
                                 num_classes=K)
    loss_nec = out[0, 0]
    loss_suf = out[0, 1]

    # prediction(): num_success is the reference's -1 placeholder, so the
    # probability term reduces to -1/len(masks) independent of the data.
    prob_nec = jnp.float32(-1.0 / P)
    prob_suf = jnp.float32(-1.0)
    return prob_nec, prob_suf, loss_nec, loss_suf


# ----------------------------------------------------------------------------
if __name__ == "__main__":
    key = jax.random.PRNGKey(0)
    (k_tx, k_xb, k_p, k_bw, k_cbw, k_mask, k_w, k_fwd) = jax.random.split(key, 8)

    C, W, H = 4, 16, 16
    N = 8           # number of samples in sample_data
    K = 8           # number of classes
    D = C * W * H   # 1024

    target_x = jax.random.normal(k_tx, (1, C, W, H), dtype=jnp.float32)
    x_batch = jax.random.normal(k_xb, (N, C, W, H), dtype=jnp.float32)
    p_raw = jax.random.uniform(k_p, (N,), dtype=jnp.float32) + 0.1
    p_xj = p_raw / jnp.sum(p_raw)
    sample_data = (x_batch, p_xj)

    feat_bandwidths = 0.5 + 0.5 * jax.random.uniform(k_bw, (C, W, H),
                                                     dtype=jnp.float32)
    class_bandwidths = 0.5 + 0.5 * jax.random.uniform(k_cbw, (K,),
                                                      dtype=jnp.float32)

    # FeatureSelector feat_mask with init_method='normal' -> randn(1, W, H)
    feat_mask_param = jax.random.normal(k_mask, (1, W, H), dtype=jnp.float32)

    # Deterministic linear classifier standing in for the external `model`.
    # TODO(synk): the external black-box model is approximated by a linear head.
    model_w = 0.02 * jax.random.normal(k_w, (D, K), dtype=jnp.float32)
    model_b = jnp.zeros((1, K), dtype=jnp.float32)

    statics = prepare_statics(target_x, feat_bandwidths, class_bandwidths,
                              model_w, model_b)

    out = fans_forward(k_fwd, sample_data, feat_mask_param, statics, ARGS)
    out = jax.block_until_ready(out)
    for o in out:
        assert not bool(jnp.any(jnp.isnan(jnp.asarray(o, dtype=jnp.float32))))
    print("KERNEL_OK")
</pallas_src>

<mosaic_0001>
module attributes {stable_mosaic.version = 11 : i64} {
  func.func @_abduction_kernel(%arg0: memref<8x1024xf32, #tpu.memory_space<vmem>>, %arg1: memref<2x1024xf32, #tpu.memory_space<vmem>>, %arg2: memref<1x1024xf32, #tpu.memory_space<vmem>>, %arg3: memref<8x1xf32, #tpu.memory_space<vmem>>, %arg4: memref<1024x128xbf16, #tpu.memory_space<vmem>>, %arg5: memref<2x128xf32, #tpu.memory_space<vmem>>, %arg6: memref<8x128xf32, #tpu.memory_space<vmem>>, %arg7: memref<8x128xf32, #tpu.memory_space<vmem>>) attributes {dimension_semantics = [], scalar_prefetch = 0 : i64, scratch_operands = 0 : i64, tpu.core_type = #tpu.core_type<tc>} {
    %c0 = arith.constant 0 : index
    %c0_0 = arith.constant 0 : index
    %0 = vector.load %arg0[%c0, %c0_0] : memref<8x1024xf32, #tpu.memory_space<vmem>>, vector<8x1024xf32>
    %c0_1 = arith.constant 0 : index
    %c0_2 = arith.constant 0 : index
    %1 = vector.load %arg1[%c0_1, %c0_2] : memref<2x1024xf32, #tpu.memory_space<vmem>>, vector<2x1024xf32>
    %2 = vector.extract_strided_slice %1 {offsets = [0, 0], sizes = [1, 1024], strides = [1, 1]} : vector<2x1024xf32> to vector<1x1024xf32>
    %3 = vector.extract_strided_slice %1 {offsets = [1, 0], sizes = [1, 1024], strides = [1, 1]} : vector<2x1024xf32> to vector<1x1024xf32>
    %c0_3 = arith.constant 0 : index
    %c0_4 = arith.constant 0 : index
    %4 = vector.load %arg2[%c0_3, %c0_4] : memref<1x1024xf32, #tpu.memory_space<vmem>>, vector<1x1024xf32>
    %c0_5 = arith.constant 0 : index
    %c0_6 = arith.constant 0 : index
    %5 = vector.load %arg3[%c0_5, %c0_6] : memref<8x1xf32, #tpu.memory_space<vmem>>, vector<8x1xf32>
    %c0_7 = arith.constant 0 : index
    %c0_8 = arith.constant 0 : index
    %6 = vector.load %arg4[%c0_7, %c0_8] : memref<1024x128xbf16, #tpu.memory_space<vmem>>, vector<1024x128xbf16>
    %c0_9 = arith.constant 0 : index
    %c0_10 = arith.constant 0 : index
    %7 = vector.load %arg5[%c0_9, %c0_10] : memref<2x128xf32, #tpu.memory_space<vmem>>, vector<2x128xf32>
    %8 = vector.extract_strided_slice %7 {offsets = [0, 0], sizes = [1, 128], strides = [1, 1]} : vector<2x128xf32> to vector<1x128xf32>
    %9 = vector.extract_strided_slice %7 {offsets = [1, 0], sizes = [1, 128], strides = [1, 1]} : vector<2x128xf32> to vector<1x128xf32>
    %10 = vector.broadcast %2 : vector<1x1024xf32> to vector<8x1024xf32>
    %11 = arith.subf %0, %10 : vector<8x1024xf32>
    %12 = vector.broadcast %3 : vector<1x1024xf32> to vector<8x1024xf32>
    %13 = arith.mulf %11, %12 : vector<8x1024xf32>
    %cst = arith.constant -5.000000e-01 : f32
    %14 = vector.broadcast %cst : f32 to vector<8x1024xf32>
    %15 = arith.mulf %14, %13 : vector<8x1024xf32>
    %16 = arith.mulf %15, %13 : vector<8x1024xf32>
    %17 = math.exp %16 : vector<8x1024xf32>
    %18 = vector.broadcast %4 : vector<1x1024xf32> to vector<8x1024xf32>
    %19 = arith.mulf %17, %18 : vector<8x1024xf32>
    %cst_11 = arith.constant 1.000000e+00 : f32
    %20 = vector.broadcast %cst_11 : f32 to vector<1x1024xf32>
    %21 = arith.subf %20, %4 : vector<1x1024xf32>
    %22 = vector.broadcast %21 : vector<1x1024xf32> to vector<8x1024xf32>
    %23 = arith.mulf %17, %22 : vector<8x1024xf32>
    %cst_12 = arith.constant dense<0.000000e+00> : vector<8xf32>
    %24 = vector.multi_reduction <add>, %19, %cst_12 [1] : vector<8x1024xf32> to vector<8xf32>
    %25 = vector.shape_cast %24 : vector<8xf32> to vector<8x1xf32>
    %cst_13 = arith.constant 9.765625E-4 : f32
    %26 = vector.broadcast %cst_13 : f32 to vector<8x1xf32>
    %27 = arith.mulf %25, %26 : vector<8x1xf32>
    %cst_14 = arith.constant dense<0.000000e+00> : vector<8xf32>
    %28 = vector.multi_reduction <add>, %23, %cst_14 [1] : vector<8x1024xf32> to vector<8xf32>
    %29 = vector.shape_cast %28 : vector<8xf32> to vector<8x1xf32>
    %cst_15 = arith.constant 9.765625E-4 : f32
    %30 = vector.broadcast %cst_15 : f32 to vector<8x1xf32>
    %31 = arith.mulf %29, %30 : vector<8x1xf32>
    %32 = tpu.iota {dimensions = array<i32: 0>} : vector<8x1024xi32>
    %c0_i32 = arith.constant 0 : i32
    %33 = vector.broadcast %c0_i32 : i32 to vector<8x1024xi32>
    %34 = arith.cmpi eq, %32, %33 : vector<8x1024xi32>
    %cst_16 = arith.constant 0.000000e+00 : f32
    %35 = vector.shape_cast %2 : vector<1x1024xf32> to vector<1x1024xf32>
    %36 = vector.broadcast %35 : vector<1x1024xf32> to vector<8x1024xf32>
    %37 = vector.broadcast %cst_16 : f32 to vector<8x1024xf32>
    %38 = arith.select %34, %36, %37 : vector<8x1024xi1>, vector<8x1024xf32>
    %39 = arith.mulf %0, %19 : vector<8x1024xf32>
    %40 = arith.mulf %0, %23 : vector<8x1024xf32>
    %41 = tpu.concatenate %38, %39, %40 in 0 : vector<8x1024xf32>, vector<8x1024xf32>, vector<8x1024xf32> -> vector<24x1024xf32>
    %42 = arith.truncf %41 : vector<24x1024xf32> to vector<24x1024xbf16>
    %cst_17 = arith.constant dense<0.000000e+00> : vector<24x128xf32>
    %43 = tpu.matmul %42, %6, %cst_17 {dimension_numbers = #tpu.dot_dimension_numbers<[1], [0], [0], [1], [0, 0, 1, 1], [], []>} : vector<24x1024xbf16>, vector<1024x128xbf16>, vector<24x128xf32> -> vector<24x128xf32>
    %44 = vector.broadcast %8 : vector<1x128xf32> to vector<24x128xf32>
    %45 = arith.addf %43, %44 : vector<24x128xf32>
    %46 = tpu.iota {dimensions = array<i32: 1>} : vector<24x128xi32>
    %47 = arith.sitofp %46 : vector<24x128xi32> to vector<24x128xf32>
    %c8_i32 = arith.constant 8 : i32
    %48 = vector.broadcast %c8_i32 : i32 to vector<24x128xi32>
    %49 = arith.cmpi slt, %46, %48 : vector<24x128xi32>
    %cst_18 = arith.constant -1.000000e+30 : f32
    %50 = vector.broadcast %cst_18 : f32 to vector<24x128xf32>
    %51 = arith.select %49, %45, %50 : vector<24x128xi1>, vector<24x128xf32>
    %cst_19 = arith.constant dense<0xFF800000> : vector<24xf32>
    %52 = vector.multi_reduction <maximumf>, %51, %cst_19 [1] : vector<24x128xf32> to vector<24xf32>
    %53 = vector.shape_cast %52 : vector<24xf32> to vector<24x1xf32>
    %54 = vector.broadcast %53 : vector<24x1xf32> to vector<24x128xf32>
    %55 = arith.cmpf oge, %51, %54 : vector<24x128xf32>
    %cst_20 = arith.constant 1.280000e+02 : f32
    %56 = vector.broadcast %cst_20 : f32 to vector<24x128xf32>
    %57 = arith.select %55, %47, %56 : vector<24x128xi1>, vector<24x128xf32>
    %cst_21 = arith.constant dense<0x7F800000> : vector<24xf32>
    %58 = vector.multi_reduction <minimumf>, %57, %cst_21 [1] : vector<24x128xf32> to vector<24xf32>
    %59 = vector.shape_cast %58 : vector<24xf32> to vector<24x1xf32>
    %60 = vector.broadcast %59 : vector<24x1xf32> to vector<24x128xf32>
    %61 = arith.cmpf oeq, %47, %60 : vector<24x128xf32>
    %62 = arith.extui %61 : vector<24x128xi1> to vector<24x128xi32>
    %63 = arith.sitofp %62 : vector<24x128xi32> to vector<24x128xf32>
    %64 = vector.extract_strided_slice %45 {offsets = [0, 0], sizes = [1, 128], strides = [1, 1]} : vector<24x128xf32> to vector<1x128xf32>
    %65 = vector.extract_strided_slice %63 {offsets = [0, 0], sizes = [1, 128], strides = [1, 1]} : vector<24x128xf32> to vector<1x128xf32>
    %66 = vector.broadcast %65 : vector<1x128xf32> to vector<24x128xf32>
    %67 = arith.subf %63, %66 : vector<24x128xf32>
    %68 = vector.broadcast %9 : vector<1x128xf32> to vector<24x128xf32>
    %69 = arith.mulf %67, %68 : vector<24x128xf32>
    %cst_22 = arith.constant -5.000000e-01 : f32
    %70 = vector.broadcast %cst_22 : f32 to vector<24x128xf32>
    %71 = arith.mulf %70, %69 : vector<24x128xf32>
    %72 = arith.mulf %71, %69 : vector<24x128xf32>
    %73 = math.exp %72 : vector<24x128xf32>
    %cst_23 = arith.constant 0.000000e+00 : f32
    %74 = vector.broadcast %cst_23 : f32 to vector<24x128xf32>
    %75 = arith.select %49, %73, %74 : vector<24x128xi1>, vector<24x128xf32>
    %cst_24 = arith.constant dense<0.000000e+00> : vector<24xf32>
    %76 = vector.multi_reduction <add>, %75, %cst_24 [1] : vector<24x128xf32> to vector<24xf32>
    %77 = vector.shape_cast %76 : vector<24xf32> to vector<24x1xf32>
    %cst_25 = arith.constant 1.250000e-01 : f32
    %78 = vector.broadcast %cst_25 : f32 to vector<24x1xf32>
    %79 = arith.mulf %77, %78 : vector<24x1xf32>
    %80 = vector.extract_strided_slice %79 {offsets = [8, 0], sizes = [8, 1], strides = [1, 1]} : vector<24x1xf32> to vector<8x1xf32>
    %81 = vector.extract_strided_slice %79 {offsets = [16, 0], sizes = [8, 1], strides = [1, 1]} : vector<24x1xf32> to vector<8x1xf32>
    %cst_26 = arith.constant 1.000000e+00 : f32
    %82 = vector.broadcast %cst_26 : f32 to vector<8x1xf32>
    %83 = arith.subf %82, %81 : vector<8x1xf32>
    %84 = tpu.iota {dimensions = array<i32: 0>} : vector<8x1xi32>
    %c0_i32_27 = arith.constant 0 : i32
    %85 = vector.broadcast %c0_i32_27 : i32 to vector<8x1xi32>
    %86 = arith.cmpi eq, %84, %85 : vector<8x1xi32>
    %cst_28 = arith.constant 1.000000e+00 : f32
    %87 = vector.broadcast %cst_28 : f32 to vector<8x1xf32>
    %88 = arith.select %86, %87, %83 : vector<8x1xi1>, vector<8x1xf32>
    %89 = arith.mulf %27, %80 : vector<8x1xf32>
    %90 = arith.mulf %31, %88 : vector<8x1xf32>
    %91 = arith.mulf %89, %5 : vector<8x1xf32>
    %92 = arith.mulf %90, %5 : vector<8x1xf32>
    %93 = math.log %3 : vector<1x1024xf32>
    %cst_29 = arith.constant dense<0.000000e+00> : vector<1xf32>
    %94 = vector.multi_reduction <add>, %93, %cst_29 [1] : vector<1x1024xf32> to vector<1xf32>
    %95 = vector.shape_cast %94 : vector<1xf32> to vector<1x1xf32>
    %cst_30 = arith.constant 0.000000e+00 : f32
    %96 = vector.broadcast %cst_30 : f32 to vector<1x1xf32>
    %97 = arith.subf %96, %95 : vector<1x1xf32>
    %cst_31 = arith.constant dense<0.000000e+00> : vector<1xf32>
    %98 = vector.multi_reduction <add>, %27, %cst_31 [0] : vector<8x1xf32> to vector<1xf32>
    %99 = vector.shape_cast %98 : vector<1xf32> to vector<1x1xf32>
    %100 = math.log %99 : vector<1x1xf32>
    %cst_32 = arith.constant 2.07944155 : f32
    %101 = vector.broadcast %cst_32 : f32 to vector<1x1xf32>
    %102 = arith.subf %100, %101 : vector<1x1xf32>
    %103 = arith.subf %102, %97 : vector<1x1xf32>
    %cst_33 = arith.constant 1.000000e-01 : f32
    %104 = vector.broadcast %cst_33 : f32 to vector<1x1xf32>
    %105 = arith.mulf %103, %104 : vector<1x1xf32>
    %106 = arith.negf %105 : vector<1x1xf32>
    %107 = math.exp %106 : vector<1x1xf32>
    %cst_34 = arith.constant 1.000000e+00 : f32
    %108 = vector.broadcast %cst_34 : f32 to vector<1x1xf32>
    %109 = arith.addf %108, %107 : vector<1x1xf32>
    %110 = arith.divf %108, %109 : vector<1x1xf32>
    %cst_35 = arith.constant dense<0.000000e+00> : vector<1xf32>
    %111 = vector.multi_reduction <add>, %31, %cst_35 [0] : vector<8x1xf32> to vector<1xf32>
    %112 = vector.shape_cast %111 : vector<1xf32> to vector<1x1xf32>
    %113 = math.log %112 : vector<1x1xf32>
    %cst_36 = arith.constant 2.07944155 : f32
    %114 = vector.broadcast %cst_36 : f32 to vector<1x1xf32>
    %115 = arith.subf %113, %114 : vector<1x1xf32>
    %116 = arith.subf %115, %97 : vector<1x1xf32>
    %cst_37 = arith.constant 1.000000e-01 : f32
    %117 = vector.broadcast %cst_37 : f32 to vector<1x1xf32>
    %118 = arith.mulf %116, %117 : vector<1x1xf32>
    %119 = arith.negf %118 : vector<1x1xf32>
    %120 = math.exp %119 : vector<1x1xf32>
    %cst_38 = arith.constant 1.000000e+00 : f32
    %121 = vector.broadcast %cst_38 : f32 to vector<1x1xf32>
    %122 = arith.addf %121, %120 : vector<1x1xf32>
    %123 = arith.divf %121, %122 : vector<1x1xf32>
    %cst_39 = arith.constant dense<0.000000e+00> : vector<1xf32>
    %124 = vector.multi_reduction <add>, %89, %cst_39 [0] : vector<8x1xf32> to vector<1xf32>
    %125 = vector.shape_cast %124 : vector<1xf32> to vector<1x1xf32>
    %cst_40 = arith.constant 1.000000e+02 : f32
    %126 = vector.broadcast %cst_40 : f32 to vector<1x1xf32>
    %127 = arith.mulf %125, %126 : vector<1x1xf32>
    %128 = arith.negf %127 : vector<1x1xf32>
    %129 = math.exp %128 : vector<1x1xf32>
    %cst_41 = arith.constant 1.000000e+00 : f32
    %130 = vector.broadcast %cst_41 : f32 to vector<1x1xf32>
    %131 = arith.addf %130, %129 : vector<1x1xf32>
    %132 = arith.divf %130, %131 : vector<1x1xf32>
    %cst_42 = arith.constant 0.000000e+00 : f32
    %133 = vector.broadcast %cst_42 : f32 to vector<1x1xf32>
    %134 = arith.cmpf one, %132, %133 : vector<1x1xf32>
    %cst_43 = arith.constant 1.000000e+00 : f32
    %135 = vector.broadcast %cst_43 : f32 to vector<1x1xf32>
    %136 = arith.select %134, %132, %135 : vector<1x1xi1>, vector<1x1xf32>
    %cst_44 = arith.constant 1.000000e+00 : f32
    %137 = vector.broadcast %cst_44 : f32 to vector<1x1xf32>
    %138 = arith.mulf %136, %137 : vector<1x1xf32>
    %cst_45 = arith.constant dense<0.000000e+00> : vector<1xf32>
    %139 = vector.multi_reduction <add>, %90, %cst_45 [0] : vector<8x1xf32> to vector<1xf32>
    %140 = vector.shape_cast %139 : vector<1xf32> to vector<1x1xf32>
    %cst_46 = arith.constant 5.000000e-01 : f32
    %141 = vector.broadcast %cst_46 : f32 to vector<1x1xf32>
    %142 = arith.mulf %140, %141 : vector<1x1xf32>
    %cst_47 = arith.constant 1.000000e+00 : f32
    %143 = vector.broadcast %cst_47 : f32 to vector<1x1xf32>
    %144 = arith.mulf %142, %143 : vector<1x1xf32>
    %145 = arith.mulf %110, %138 : vector<1x1xf32>
    %146 = arith.mulf %123, %144 : vector<1x1xf32>
    %147 = tpu.iota {dimensions = array<i32: 1>} : vector<8x128xi32>
    %c0_i32_48 = arith.constant 0 : i32
    %148 = vector.broadcast %c0_i32_48 : i32 to vector<8x128xi32>
    %149 = arith.cmpi eq, %147, %148 : vector<8x128xi32>
    %c1_i32 = arith.constant 1 : i32
    %150 = vector.broadcast %c1_i32 : i32 to vector<8x128xi32>
    %151 = arith.cmpi eq, %147, %150 : vector<8x128xi32>
    %cst_49 = arith.constant 0.000000e+00 : f32
    %152 = vector.shape_cast %92 : vector<8x1xf32> to vector<8x1xf32>
    %153 = vector.broadcast %152 : vector<8x1xf32> to vector<8x128xf32>
    %154 = vector.broadcast %cst_49 : f32 to vector<8x128xf32>
    %155 = arith.select %151, %153, %154 : vector<8x128xi1>, vector<8x128xf32>
    %156 = vector.shape_cast %91 : vector<8x1xf32> to vector<8x1xf32>
    %157 = vector.broadcast %156 : vector<8x1xf32> to vector<8x128xf32>
    %158 = arith.select %149, %157, %155 : vector<8x128xi1>, vector<8x128xf32>
    %c0_50 = arith.constant 0 : index
    %c0_51 = arith.constant 0 : index
    %159 = vector.load %arg6[%c0_50, %c0_51] : memref<8x128xf32, #tpu.memory_space<vmem>>, vector<8x128xf32>
    tpu.vector_store %arg6[%c0_50, %c0_51], %158 {strides = array<i32>} : memref<8x128xf32, #tpu.memory_space<vmem>>, vector<8x128xf32>,
    %160 = tpu.iota {dimensions = array<i32: 1>} : vector<1x128xi32>
    %c0_i32_52 = arith.constant 0 : i32
    %161 = vector.broadcast %c0_i32_52 : i32 to vector<1x128xi32>
    %162 = arith.cmpi eq, %160, %161 : vector<1x128xi32>
    %c1_i32_53 = arith.constant 1 : i32
    %163 = vector.broadcast %c1_i32_53 : i32 to vector<1x128xi32>
    %164 = arith.cmpi eq, %160, %163 : vector<1x128xi32>
    %cst_54 = arith.constant 0.000000e+00 : f32
    %165 = vector.shape_cast %146 : vector<1x1xf32> to vector<1x1xf32>
    %166 = vector.broadcast %165 : vector<1x1xf32> to vector<1x128xf32>
    %167 = vector.broadcast %cst_54 : f32 to vector<1x128xf32>
    %168 = arith.select %164, %166, %167 : vector<1x128xi1>, vector<1x128xf32>
    %169 = vector.shape_cast %145 : vector<1x1xf32> to vector<1x1xf32>
    %170 = vector.broadcast %169 : vector<1x1xf32> to vector<1x128xf32>
    %171 = arith.select %162, %170, %168 : vector<1x128xi1>, vector<1x128xf32>
    %172 = tpu.iota {dimensions = array<i32: 0>} : vector<8x128xi32>
    %c0_i32_55 = arith.constant 0 : i32
    %173 = vector.broadcast %c0_i32_55 : i32 to vector<8x128xi32>
    %174 = arith.cmpi eq, %172, %173 : vector<8x128xi32>
    %c1_i32_56 = arith.constant 1 : i32
    %175 = vector.broadcast %c1_i32_56 : i32 to vector<8x128xi32>
    %176 = arith.cmpi eq, %172, %175 : vector<8x128xi32>
    %c2_i32 = arith.constant 2 : i32
    %177 = vector.broadcast %c2_i32 : i32 to vector<8x128xi32>
    %178 = arith.cmpi eq, %172, %177 : vector<8x128xi32>
    %c3_i32 = arith.constant 3 : i32
    %179 = vector.broadcast %c3_i32 : i32 to vector<8x128xi32>
    %180 = arith.cmpi eq, %172, %179 : vector<8x128xi32>
    %cst_57 = arith.constant 0.000000e+00 : f32
    %181 = vector.shape_cast %171 : vector<1x128xf32> to vector<1x128xf32>
    %182 = vector.broadcast %181 : vector<1x128xf32> to vector<8x128xf32>
    %183 = vector.broadcast %cst_57 : f32 to vector<8x128xf32>
    %184 = arith.select %180, %182, %183 : vector<8x128xi1>, vector<8x128xf32>
    %185 = vector.shape_cast %8 : vector<1x128xf32> to vector<1x128xf32>
    %186 = vector.broadcast %185 : vector<1x128xf32> to vector<8x128xf32>
    %187 = arith.select %178, %186, %184 : vector<8x128xi1>, vector<8x128xf32>
    %188 = vector.shape_cast %65 : vector<1x128xf32> to vector<1x128xf32>
    %189 = vector.broadcast %188 : vector<1x128xf32> to vector<8x128xf32>
    %190 = arith.select %176, %189, %187 : vector<8x128xi1>, vector<8x128xf32>
    %191 = vector.shape_cast %64 : vector<1x128xf32> to vector<1x128xf32>
    %192 = vector.broadcast %191 : vector<1x128xf32> to vector<8x128xf32>
    %193 = arith.select %174, %192, %190 : vector<8x128xi1>, vector<8x128xf32>
    %c0_58 = arith.constant 0 : index
    %c0_59 = arith.constant 0 : index
    %194 = vector.load %arg7[%c0_58, %c0_59] : memref<8x128xf32, #tpu.memory_space<vmem>>, vector<8x128xf32>
    tpu.vector_store %arg7[%c0_58, %c0_59], %193 {strides = array<i32>} : memref<8x128xf32, #tpu.memory_space<vmem>>, vector<8x128xf32>,
    return
  }
}

</mosaic_0001>

<bundles_post_ra>
// kernel: tpu_custom_call.1
= control target key start
LH: loop header
LB: loop body
LE: loop exit
PB: predicated region body
PF: predicated region fallthrough
CT: control target
= control target key end

     0   :  { %13 = vsyncpa [#allocation3], 0  ;;  %s2236_s0 = inlined_call_operand.hbm [shape: f32[8,1024], index: 0, kind: input, shape index: {}]   ;;  %s2237_s1 = inlined_call_operand.hbm [shape: f32[2,1024], index: 1, kind: input, shape index: {}]   ;;  %s2238_s2 = inlined_call_operand.vmem [shape: f32[1,1024], index: 2, kind: input, shape index: {}]   ;;  %s2239_s3 = inlined_call_operand.vmem [shape: f32[8,1], index: 3, kind: input, shape index: {}]   ;;  %s2240_s4 = inlined_call_operand.hbm [shape: bf16[1024,128], index: 4, kind: input, shape index: {}]   ;;  %s2241_s5 = inlined_call_operand.vmem [shape: f32[2,128], index: 5, kind: input, shape index: {}]   ;;  %s2242_s6 = inlined_call_operand.hbm [shape: f32[8,128], index: 6, kind: output, shape index: {0}]   ;;  %s2243_s7 = inlined_call_operand.hbm [shape: f32[8,128], index: 7, kind: output, shape index: {1}]  }
   0x1   :  { %14 = vsyncpa [#allocation6], 0 }
   0x2   :  { %15 = vsyncpa [#allocation4], 0 }
   0x3   :  { %16 = vsyncpa [#allocation10], 0  ;;  %s1828_s24 = smov [#allocation5]   ;;  %s1829_s26 = smov [#allocation2]  }
   0x4   :  { %s33_s25 = sshll.u32 %s1828_s24, 4  ;;  %s23_s27 = sshll.u32 %s1829_s26, 4  ;;  %s34_s25 = int_to_ptr.vmem [resolvable:$true] %s33_s25  ;;  %s24_s27 = int_to_ptr.vmem [resolvable:$true] %s23_s27 }
   0x5   :  { %s1728_s28 = scalar_lea.vmem %s34_s25, 256  ;;  %p1733_p1 = scmp.lt.s32.totalorder %s34_s25, %s34_s25 }
   0x6   :  { %p1729_p0 = scmp.ne.s32.totalorder %s34_s25, %s1728_s28  ;;  %p1734_p2 = scmp.lt.s32.totalorder %s1728_s28, %s1728_s28 }
   0x8   :  { %p1735_p3 = por %p1734_p2, %p1733_p1 }
   0xa   :  { %p1736_p4 = pnand %p1735_p3, %p1729_p0 }
   0xc   :  { %1739 = shalt.err (!%p1736_p4)
}
   0xd   :  { %36 = dma.hbm_to_vmem [thread:$0]  %s2237_s1, 256, %s34_s25, [#allocation6]  }
   0xe   :  { %s1748_s8 = scalar_lea.vmem %s24_s27, 1024  ;;  %p1753_p6 = scmp.lt.s32.totalorder %s24_s27, %s24_s27 }
   0xf   :  { %p1749_p5 = scmp.ne.s32.totalorder %s24_s27, %s1748_s8  ;;  %p1754_p7 = scmp.lt.s32.totalorder %s1748_s8, %s1748_s8 }
  0x11   :  { %p1755_p8 = por %p1754_p7, %p1753_p6 }
  0x13   :  { %p1756_p9 = pnand %p1755_p8, %p1749_p5 }
  0x15   :  { %1759 = shalt.err (!%p1756_p9)
}
  0x16   :  { %26 = dma.hbm_to_vmem [thread:$0]  %s2236_s0, 1024, %s24_s27, [#allocation3]  }
  0x17   :  { %s1830_s11 = smov [#allocation7]  }
  0x18   :  { %s46_s12 = sshll.u32 %s1830_s11, 4  ;;  %s47_s12 = int_to_ptr.vmem [resolvable:$true] %s46_s12 }
  0x19   :  { %s1768_s13 = scalar_lea.vmem %s47_s12, 8192  ;;  %p1773_p11 = scmp.lt.s32.totalorder %s47_s12, %s47_s12 }
  0x1a   :  { %p1769_p10 = scmp.ne.s32.totalorder %s47_s12, %s1768_s13  ;;  %p1774_p12 = scmp.lt.s32.totalorder %s1768_s13, %s1768_s13 }
  0x1c   :  { %p1775_p13 = por %p1774_p12, %p1773_p11 }
  0x1e   :  { %p1776_p0 = pnand %p1775_p13, %p1769_p10 }
  0x20   :  { %1779 = shalt.err (!%p1776_p0)
}
  0x21   :  { %s1831_s1 = smov 64   ;;  %s1832_s14 = smov 4  }
  0x22   :  { %52 = dma.hbm_to_vmem [thread:$0]  %s2240_s4, 8192, %s47_s12, [#allocation6], %s1831_s1, %s1831_s1, %s1832_s14  }
  0x23   :  { %1820 = dma.done.wait [#allocation3], 1024  }
  0x24   :  { %1821 = vsyncadd [#allocation3], 4294966272 }
  0x25   :  { %1822 = dma.done.wait [#allocation6], 8448  }
  0x26   :  { %1823 = vsyncadd [#allocation6], 4294958848  ;;  %v1616_v0 = vld [vmem:[#allocation7 + $0x78] sm:$0xff]   ;;  %v1620_v4 = vld [vmem:[#allocation7 + $0x70] sm:$0xff]   ;;  %v208_v18 = vlaneseq  ;;  %vm1833_vm1 = vmmov 1   ;;  %vm1256_vm9 = vcmask 1041409  }
  0x27   :  { %v1617_v1 = vld [vmem:[#allocation7 + $0xf8] sm:$0xff]   ;;  %1492 = vmatprep.subr.bf16.mxu0 %v1616_v0  ;;  %v1621_v5 = vld [vmem:[#allocation7 + $0xf0] sm:$0xff]   ;;  %v1624_v8 = vld [vmem:[#allocation7 + $0x68] sm:$0xff]  }
  0x28   :  { %v1618_v2 = vld [vmem:[#allocation7 + $0x38] sm:$0xff]   ;;  %1520 = vmatprep.subr.bf16.mxu1 %v1617_v1  ;;  %v1622_v6 = vld [vmem:[#allocation7 + $0x30] sm:$0xff]   ;;  %v1625_v9 = vld [vmem:[#allocation7 + $0xe8] sm:$0xff]   ;;  %v1888_v23 = vshrl.u32 %v208_v18, 7 }
  0x29   :  { %v1619_v3 = vld [vmem:[#allocation7 + $0xb8] sm:$0xff]   ;;  %1493 = vmatpush3.bf16.msra.mxu0 %v1618_v2  ;;  %v1623_v7 = vld [vmem:[#allocation7 + $0xb0] sm:$0xff]   ;;  %v1626_v10 = vld [vmem:[#allocation7 + $0x28] sm:$0xff]  }
  0x2a   :  { %1521 = vmatpush3.bf16.msra.mxu1 %v1619_v3  ;;  %1494 = vmatprep.subr.bf16.mxu0 %v1620_v4  ;;  %v1627_v11 = vld [vmem:[#allocation7 + $0xa8] sm:$0xff]   ;;  %v1628_v12 = vld [vmem:[#allocation7 + $0x60] sm:$0xff]   ;;  %v1632_v16 = vld [vmem:[#allocation7 + $0x58] sm:$0xff]   ;;  %v1891_v28 = vsub.s32 0, %v1888_v23  ;;  %v1894_v30 = vsub.s32 2, %v1888_v23  ;;  %v1897_v32 = vsub.s32 1, %v1888_v23 }
  0x2b   :  { %1522 = vmatprep.subr.bf16.mxu1 %v1621_v5  ;;  %v1629_v13 = vld [vmem:[#allocation7 + $0xe0] sm:$0xff]   ;;  %v1633_v17 = vld [vmem:[#allocation7 + $0xd8] sm:$0xff]   ;;  %v1636_v21 = vld [vmem:[#allocation7 + $0x50] sm:$0xff]   ;;  %v1900_v34 = vsub.s32 3, %v1888_v23  ;;  %v1903_v36 = vsub.s32 4, %v1888_v23  ;;  %v1906_v38 = vsub.s32 6, %v1888_v23 }
  0x2c   :  { %v1630_v14 = vld [vmem:[#allocation7 + $0x20] sm:$0xff]   ;;  %v1634_v19 = vld [vmem:[#allocation7 + $0x18] sm:$0xff]   ;;  %v1637_v22 = vld [vmem:[#allocation7 + $0xd0] sm:$0xff]   ;;  %v1913_v42 = vsub.s32 5, %v1888_v23  ;;  %v1916_v43 = vsub.s32 7, %v1888_v23  ;;  %vm521_vm0 = vcmp.eq.s32.totalorder %v1888_v23, 0 }
  0x2d   :  { %1495 = vmatpush3.bf16.msra.mxu0 %v1622_v6  ;;  %v1631_v15 = vld [vmem:[#allocation7 + $0xa0] sm:$0xff]   ;;  %v1635_v20 = vld [vmem:[#allocation7 + $0x98] sm:$0xff]   ;;  %v1638_v24 = vld [vmem:[#allocation7 + $0x10] sm:$0xff]   ;;  %vm1352_vm14 = vcmp.eq.s32.totalorder %v1888_v23, 3  ;;  %vm1351_vm15 = vcmp.eq.s32.totalorder %v1888_v23, 2 }
  0x2e   :  { %1523 = vmatpush3.bf16.msra.mxu1 %v1623_v7  ;;  %1496 = vmatprep.subr.bf16.mxu0 %v1624_v8  ;;  %v1639_v25 = vld [vmem:[#allocation7 + $0x90] sm:$0xff]   ;;  %v1640_v26 = vld [vmem:[#allocation7 + $0x48] sm:$0xff]   ;;  %v1644_v33 = vld [vmem:[#allocation7 + $0x40] sm:$0xff]  }
  0x2f   :  { %1524 = vmatprep.subr.bf16.mxu1 %v1625_v9  ;;  %v1641_v27 = vld [vmem:[#allocation7 + $0xc8] sm:$0xff]   ;;  %v1645_v35 = vld [vmem:[#allocation7 + $0xc0] sm:$0xff]   ;;  %v1908_v40 = vld [vmem:[#allocation2] sm:$0xff] }
  0x30   :  { %v1642_v29 = vld [vmem:[#allocation7 + $0x8] sm:$0xff]   ;;  %v1646_v37 = vld [vmem:[#allocation7] sm:$0xff]   ;;  %v1910_v41 = vld [vmem:[#allocation5] sm:$0xff] }
  0x31   :  { %1497 = vmatpush3.bf16.msra.mxu0 %v1626_v10  ;;  %v1643_v31 = vld [vmem:[#allocation7 + $0x88] sm:$0xff]   ;;  %v1647_v39 = vld [vmem:[#allocation7 + $0x80] sm:$0xff]   ;;  %v1918_v44 = vld [vmem:[#allocation2 + $0x8] sm:$0xff]  ;;  %v211_v45 = vrot.slane %v1910_v41, %v1891_v28  ;;  %v215_v46 = vrot.slane %v1910_v41, %v1894_v30  ;;  %v291_v47 = vrot.slane %v1910_v41, %v1897_v32  ;;  %v295_v48 = vrot.slane %v1910_v41, %v1900_v34 }
  0x32   :  { %1525 = vmatpush3.bf16.msra.mxu1 %v1627_v11  ;;  %1498 = vmatprep.subr.bf16.mxu0 %v1628_v12  ;;  %v1928_v49 = vld [vmem:[#allocation2 + $0x10] sm:$0xff]  ;;  %v1930_v50 = vld [vmem:[#allocation2 + $0x18] sm:$0xff]  ;;  %v219_v51 = vrot.slane %v1910_v41, %v1903_v36  ;;  %v223_v52 = vrot.slane %v1910_v41, %v1906_v38  ;;  %v1648_v53 = vld [vmem:[#allocation7 + $0x178] sm:$0xff]   ;;  %v299_v61 = vrot.slane %v1910_v41, %v1913_v42 }
  0x33   :  { %1526 = vmatprep.subr.bf16.mxu1 %v1629_v13  ;;  %v1937_v54 = vrot.slane %v211_v45, %v1891_v28  ;;  %v1940_v55 = vrot.slane %v215_v46, %v1891_v28  ;;  %v331_v56 = vrot.slane %v291_v47, %v1897_v32  ;;  %v335_v57 = vrot.slane %v295_v48, %v1897_v32  ;;  %v1649_v58 = vld [vmem:[#allocation7 + $0x1f8] sm:$0xff]   ;;  %vm1997_vm2 = vmpackc.low %vm1833_vm1, %vm521_vm0 }
  0x34   :  { %v1945_v59 = vrot.slane %v219_v51, %v1891_v28  ;;  %v1948_v60 = vrot.slane %v223_v52, %v1891_v28  ;;  %v303_v62 = vrot.slane %v1910_v41, %v1916_v43  ;;  %v339_v3 = vrot.slane %v299_v61, %v1897_v32 }
  0x35   :  { %1499 = vmatpush3.bf16.msra.mxu0 %v1630_v14  ;;  %v280_v63 = vsub.f32 %v1908_v40, %v1937_v54  ;;  %v281_v0 = vsub.f32 %v1918_v44, %v1940_v55  ;;  %vm1350_vm1 = vcmp.eq.s32.totalorder %v1888_v23, 1 }
  0x36   :  { %1527 = vmatpush3.bf16.msra.mxu1 %v1631_v15  ;;  %1500 = vmatprep.subr.bf16.mxu0 %v1632_v16  ;;  %v282_v1 = vsub.f32 %v1928_v49, %v1945_v59  ;;  %v283_v2 = vsub.f32 %v1930_v50, %v1948_v60  ;;  %v343_v4 = vrot.slane %v303_v62, %v1897_v32 }
  0x37   :  { %1528 = vmatprep.subr.bf16.mxu1 %v1633_v17  ;;  %v360_v5 = vmul.f32 %v331_v56, %v280_v63  ;;  %v361_v6 = vmul.f32 %v335_v57, %v281_v0 }
  0x38   :  { %v362_v7 = vmul.f32 %v339_v3, %v282_v1  ;;  %v363_v8 = vmul.f32 %v343_v4, %v283_v2 }
  0x39   :  { %1501 = vmatpush3.bf16.msra.mxu0 %v1634_v19  ;;  %v368_v9 = vmul.f32 -0.5, %v360_v5  ;;  %v369_v10 = vmul.f32 -0.5, %v361_v6 }
  0x3a   :  { %1529 = vmatpush3.bf16.msra.mxu1 %v1635_v20  ;;  %1502 = vmatprep.subr.bf16.mxu0 %v1636_v21  ;;  %v370_v11 = vmul.f32 -0.5, %v362_v7  ;;  %v371_v12 = vmul.f32 -0.5, %v363_v8 }
  0x3b   :  { %1530 = vmatprep.subr.bf16.mxu1 %v1637_v22  ;;  %v376_v13 = vmul.f32 %v368_v9, %v360_v5  ;;  %v377_v14 = vmul.f32 %v369_v10, %v361_v6  ;;  %v1967_v22 = vld [vmem:[%s2238_s2] sm:$0xff] }
  0x3c   :  { %v378_v15 = vmul.f32 %v370_v11, %v362_v7  ;;  %v379_v16 = vmul.f32 %v371_v12, %v363_v8  ;;  %v1650_v8 = vld [vmem:[#allocation7 + $0x138] sm:$0xff]   ;;  %v1652_v10 = vld [vmem:[#allocation7 + $0x170] sm:$0xff]  }
  0x3d   :  { %1503 = vmatpush3.bf16.msra.mxu0 %v1638_v24  ;;  %v384_v17 = vmul.f32 1.442695, %v376_v13  ;;  %v386_v19 = vmul.f32 1.442695, %v377_v14  ;;  %v1970_v24 = vsub.f32 1.0, %v1967_v22  ;;  %v2012_v13 = vld [vmem:[#allocation5 + $0x8] sm:$0xff] }
  0x3e   :  { %1531 = vmatpush3.bf16.msra.mxu1 %v1639_v25  ;;  %1504 = vmatprep.subr.bf16.mxu0 %v1640_v26  ;;  %v388_v20 = vmul.f32 1.442695, %v378_v15  ;;  %v390_v21 = vmul.f32 1.442695, %v379_v16  ;;  %v404_v25 = vrot.slane %v1967_v22, %v1891_v28  ;;  %v1651_v15 = vld [vmem:[#allocation7 + $0x1b8] sm:$0xff]   ;;  %v231_v16 = vrot.slane %v2012_v13, %v1894_v30 }
  0x3f   :  { %1532 = vmatprep.subr.bf16.mxu1 %v1641_v27  ;;  %1680 = vpow2.f32 %v384_v17  ;;  %v454_v26 = vrot.slane %v1970_v24, %v1891_v28  ;;  %v408_v27 = vrot.slane %v1967_v22, %v1897_v32  ;;  %v462_v46 = vrot.slane %v1970_v24, %v1894_v30  ;;  %v1653_v17 = vld [vmem:[#allocation7 + $0x1f0] sm:$0xff]  }
  0x40   :  { %1682 = vpow2.f32 %v386_v19 }
  0x41   :  { %1505 = vmatpush3.bf16.msra.mxu0 %v1642_v29  ;;  %1684 = vpow2.f32 %v388_v20  ;;  %v458_v29 = vrot.slane %v1970_v24, %v1897_v32 }
  0x42   :  { %1533 = vmatpush3.bf16.msra.mxu1 %v1643_v31  ;;  %1506 = vmatprep.subr.bf16.mxu0 %v1644_v33  ;;  %1686 = vpow2.f32 %v390_v21  ;;  %v412_v31 = vrot.slane %v1967_v22, %v1894_v30  ;;  %v2028_v21 = vld [vmem:[#allocation2 + $0x28] sm:$0xff]  ;;  %v319_v30 = vrot.slane %v2012_v13, %v1916_v43 }
  0x43   :  { %1534 = vmatprep.subr.bf16.mxu1 %v1645_v35  ;;  %v416_v35 = vrot.slane %v1967_v22, %v1900_v34 }
  0x45   :  { %1507 = vmatpush3.bf16.msra.mxu0 %v1646_v37 }
  0x46   :  { %1535 = vmatpush3.bf16.msra.mxu1 %v1647_v39  ;;  %1548 = vmatprep.subr.bf16.mxu0 %v1648_v53 }
  0x47   :  { %1576 = vmatprep.subr.bf16.mxu1 %v1649_v58  ;;  %v466_v58 = vrot.slane %v1970_v24, %v1900_v34 }
  0x4c   :  { %v1681_v33 = vpop.eup %1680 }
  0x4d   :  { %v1683_v37 = vpop.eup %1682  ;;  %v441_v39 = vmul.f32 %v1681_v33, %v404_v25  ;;  %v491_v45 = vmul.f32 %v1681_v33, %v454_v26  ;;  %v1654_v25 = vld [vmem:[#allocation7 + $0x130] sm:$0xff]   ;;  %v2037_v26 = vrot.slane %v231_v16, %v1891_v28  ;;  %v1664_v16 = vld [vmem:[#allocation7 + $0x158] sm:$0xff]  }
  0x4e   :  { %v1685_v47 = vpop.eup %1684  ;;  %v442_v48 = vmul.f32 %v1683_v37, %v408_v27  ;;  %v492_v51 = vmul.f32 %v1683_v37, %v458_v29  ;;  %v2040_v27 = vld [vmem:[#allocation2 + $0x38] sm:$0xff]  ;;  %v2050_v37 = vld [vmem:[#allocation2 + $0x20] sm:$0xff] }
  0x4f   :  { %v1687_v52 = vpop.eup %1686  ;;  %v443_v53 = vmul.f32 %v1685_v47, %v412_v31  ;;  %v530_v56 = vmul.f32 %v441_v39, %v1908_v40  ;;  %v1989_v57 = vmul.f32 %v491_v45, %v1908_v40  ;;  %v493_v4 = vmul.f32 %v1685_v47, %v462_v46  ;;  %v1656_v29 = vld [vmem:[#allocation7 + $0x168] sm:$0xff]  }
  0x50   :  { %v499_v61 = vadd.f32 %v442_v48, %v441_v39  ;;  %v531_v62 = vmul.f32 %v442_v48, %v1918_v44  ;;  %v444_v63 = vmul.f32 %v1687_v52, %v416_v35  ;;  %v539_v0 = vmul.f32 %v492_v51, %v1918_v44  ;;  %v1655_v39 = vld [vmem:[#allocation7 + $0x1b0] sm:$0xff]   ;;  %v1657_v48 = vld [vmem:[#allocation7 + $0x1e8] sm:$0xff]  }
  0x51   :  { %v1464_v2 = vpack.c.bf16 %v530_v56, %v1937_v54  ;;  %v532_v40 = vmul.f32 %v443_v53, %v1928_v49  ;;  %v509_v3 = vadd.f32 %v492_v51, %v491_v45  ;;  %v554_v44 = vpack.c.bf16 %v1989_v57, %v1989_v57  ;;  %v1658_v56 = vld [vmem:[#allocation7 + $0x128] sm:$0xff]   ;;  %v1665_v57 = vld [vmem:[#allocation7 + $0x1d8] sm:$0xff]  }
  0x52   :  { %v1461_v5 = vpack.c.bf16 %v531_v62, %v1940_v55  ;;  %v500_v6 = vadd.f32 %v499_v61, %v443_v53  ;;  %v533_v7 = vmul.f32 %v444_v63, %v1930_v50  ;;  %v555_v11 = vpack.c.bf16 %v539_v0, %v539_v0  ;;  %v1660_v0 = vld [vmem:[#allocation7 + $0x160] sm:$0xff]  }
  0x53   :  { %v1470_v9 = vpack.c.bf16 %v532_v40, %v1945_v59  ;;  %v2008_v12 = vmul.f32 %v1687_v52, %v466_v58  ;;  %v2010_v54 = vadd.f32 %v509_v3, %v493_v4  ;;  %v311_v59 = vrot.slane %v2012_v13, %v1900_v34 }
  0x54   :  { %1462 = vmatprep.mubr.msk.bf16.mxu0 %vm1997_vm2, %v1461_v5  ;;  %v2016_v55 = vadd.f32 %v500_v6, %v444_v63  ;;  %v1467_v14 = vpack.c.bf16 %v533_v7, %v1948_v60  ;;  %v540_v20 = vmul.f32 %v493_v4, %v1928_v49  ;;  %v239_v60 = vrot.slane %v2012_v13, %v1906_v38  ;;  %v2068_v63 = vld [vmem:[#allocation2 + $0x30] sm:$0xff]  ;;  %v1659_v5 = vld [vmem:[#allocation7 + $0x1a8] sm:$0xff]  }
  0x55   :  { %1465 = vmatmul.mubr.msk.bf16.vlgmr.msra.gmra.mxu0 %vm1997_vm2, %v1464_v2  ;;  %v541_v19 = vmul.f32 %v2008_v12, %v1930_v50  ;;  %v351_v50 = vrot.slane %v311_v59, %v1897_v32  ;;  %v227_v49 = vrot.slane %v2012_v13, %v1891_v28  ;;  %v359_v35 = vrot.slane %v319_v30, %v1897_v32 }
  0x56   :  { %1468 = vmatprep.mubr.msk.bf16.mxu1 %vm1997_vm2, %v1467_v14  ;;  %1549 = vmatpush3.bf16.msra.mxu0 %v1650_v8  ;;  %v2047_v33 = vrot.slane %v239_v60, %v1891_v28  ;;  %v285_v45 = vsub.f32 %v2028_v21, %v2037_v26  ;;  %v307_v47 = vrot.slane %v2012_v13, %v1897_v32  ;;  %v1661_v8 = vld [vmem:[#allocation7 + $0x1e0] sm:$0xff]  }
  0x57   :  { %1471 = vmatmul.mubr.msk.bf16.vlgmr.msra.gmra.mxu1 %vm1997_vm2, %v1470_v9  ;;  %1550 = vmatprep.subr.bf16.mxu0 %v1652_v10  ;;  %v557_v31 = vpack.c.bf16 %v541_v19, %v541_v19  ;;  %v2055_v46 = vrot.slane %v227_v49, %v1891_v28  ;;  %v235_v52 = vrot.slane %v2012_v13, %v1903_v36  ;;  %v1663_v19 = vld [vmem:[#allocation7 + $0x1a0] sm:$0xff]   ;;  %v1668_v49 = vld [vmem:[#allocation7 + $0x150] sm:$0xff]  }
  0x58   :  { %1577 = vmatpush3.bf16.msra.mxu1 %v1651_v15  ;;  %990 = vmatprep.mubr.bf16.mxu0 %v555_v11  ;;  %v287_v51 = vsub.f32 %v2040_v27, %v2047_v33  ;;  %v315_v53 = vrot.slane %v2012_v13, %v1913_v42  ;;  %v365_v58 = vmul.f32 %v351_v50, %v285_v45  ;;  %v1662_v11 = vld [vmem:[#allocation7 + $0x120] sm:$0xff]   ;;  %v1670_v45 = vld [vmem:[#allocation7 + $0x110] sm:$0xff]  }
  0x59   :  { %1578 = vmatprep.subr.bf16.mxu1 %v1653_v17  ;;  %1038 = vmatprep.mubr.bf16.mxu1 %v557_v31  ;;  %v284_v61 = vsub.f32 %v2050_v37, %v2055_v46  ;;  %v347_v62 = vrot.slane %v307_v47, %v1897_v32  ;;  %v556_v2 = vpack.c.bf16 %v540_v20, %v540_v20  ;;  %v1667_v31 = vld [vmem:[#allocation7 + $0x198] sm:$0xff]   ;;  %v1672_v47 = vld [vmem:[#allocation7 + $0x148] sm:$0xff]  }
  0x5a   :  { %1551 = vmatpush3.bf16.msra.mxu0 %v1654_v25  ;;  %v367_v40 = vmul.f32 %v359_v35, %v287_v51  ;;  %v2071_v3 = vrot.slane %v235_v52, %v1891_v28  ;;  %v355_v4 = vrot.slane %v315_v53, %v1897_v32  ;;  %v373_v6 = vmul.f32 -0.5, %v365_v58  ;;  %v1666_v25 = vld [vmem:[#allocation7 + $0x118] sm:$0xff]   ;;  %v1669_v35 = vld [vmem:[#allocation7 + $0x1d0] sm:$0xff]   ;;  %v1673_v51 = vld [vmem:[#allocation7 + $0x1c8] sm:$0xff]  }
  0x5b   :  { %1552 = vmatprep.subr.bf16.mxu0 %v1656_v29  ;;  %v364_v7 = vmul.f32 %v347_v62, %v284_v61  ;;  %v1674_v52 = vld [vmem:[#allocation7 + $0x108] sm:$0xff]   ;;  %v1676_v53 = vld [vmem:[#allocation7 + $0x140] sm:$0xff]   ;;  %v474_v61 = vrot.slane %v1970_v24, %v1913_v42 }
  0x5c   :  { %1579 = vmatpush3.bf16.msra.mxu1 %v1655_v39  ;;  %v375_v9 = vmul.f32 -0.5, %v367_v40  ;;  %v286_v10 = vsub.f32 %v2068_v63, %v2071_v3  ;;  %v381_v14 = vmul.f32 %v373_v6, %v365_v58  ;;  %v424_v58 = vrot.slane %v1967_v22, %v1913_v42  ;;  %v1677_v62 = vld [vmem:[#allocation7 + $0x1c0] sm:$0xff]  }
  0x5d   :  { %1580 = vmatprep.subr.bf16.mxu1 %v1657_v48  ;;  %991 = vmatmul.mubr.bf16.gmra.mxu0 %v554_v44  ;;  %v372_v15 = vmul.f32 -0.5, %v364_v7  ;;  %v1671_v48 = vld [vmem:[#allocation7 + $0x190] sm:$0xff]  }
  0x5e   :  { %1553 = vmatpush3.bf16.msra.mxu0 %v1658_v56  ;;  %v383_v59 = vmul.f32 %v375_v9, %v367_v40  ;;  %v366_v17 = vmul.f32 %v355_v4, %v286_v10  ;;  %v394_v20 = vmul.f32 1.442695, %v381_v14  ;;  %v1675_v56 = vld [vmem:[#allocation7 + $0x188] sm:$0xff]   ;;  %v1678_v40 = vld [vmem:[#allocation7 + $0x100] sm:$0xff]   ;;  %v420_v4 = vrot.slane %v1967_v22, %v1903_v36 }
  0x5f   :  { %1554 = vmatprep.subr.bf16.mxu0 %v1660_v0  ;;  %1039 = vmatmul.mubr.bf16.gmra.mxu1 %v556_v2  ;;  %v380_v60 = vmul.f32 %v372_v15, %v364_v7  ;;  %v432_v0 = vrot.slane %v1967_v22, %v1916_v43  ;;  %v482_v2 = vrot.slane %v1970_v24, %v1916_v43  ;;  %v1679_v7 = vld [vmem:[#allocation7 + $0x180] sm:$0xff]  }
  0x60   :  { %1581 = vmatpush3.bf16.msra.mxu1 %v1659_v5  ;;  %v398_v44 = vmul.f32 1.442695, %v383_v59  ;;  %v374_v30 = vmul.f32 -0.5, %v366_v17  ;;  %1688 = vpow2.f32 %v394_v20  ;;  %v470_v10 = vrot.slane %v1970_v24, %v1903_v36 }
  0x61   :  { %1582 = vmatprep.subr.bf16.mxu1 %v1661_v8  ;;  %v392_v50 = vmul.f32 1.442695, %v380_v60  ;;  %v428_v14 = vrot.slane %v1967_v22, %v1906_v38  ;;  %v478_v22 = vrot.slane %v1970_v24, %v1906_v38 }
  0x62   :  { %1555 = vmatpush3.bf16.msra.mxu0 %v1662_v11  ;;  %1690 = vpow2.f32 %v398_v44  ;;  %v382_v29 = vmul.f32 %v374_v30, %v366_v17 }
  0x63   :  { %1556 = vmatprep.subr.bf16.mxu0 %v1664_v16  ;;  %1692 = vpow2.f32 %v392_v50 }
  0x64   :  { %1583 = vmatpush3.bf16.msra.mxu1 %v1663_v19  ;;  %v396_v39 = vmul.f32 1.442695, %v382_v29 }
  0x65   :  { %1584 = vmatprep.subr.bf16.mxu1 %v1665_v57 }
  0x66   :  { %1557 = vmatpush3.bf16.msra.mxu0 %v1666_v25  ;;  %1694 = vpow2.f32 %v396_v39 }
  0x67   :  { %1558 = vmatprep.subr.bf16.mxu0 %v1668_v49  ;;  %1696 = vlog2.f32 %v1910_v41 }
  0x68   :  { %1585 = vmatpush3.bf16.msra.mxu1 %v1667_v31  ;;  %1698 = vlog2.f32 %v2012_v13 }
  0x69   :  { %1586 = vmatprep.subr.bf16.mxu1 %v1669_v35 }
  0x6a   :  { %1559 = vmatpush3.bf16.msra.mxu0 %v1670_v45 }
  0x6b   :  { %1560 = vmatprep.subr.bf16.mxu0 %v1672_v47 }
  0x6c   :  { %1587 = vmatpush3.bf16.msra.mxu1 %v1671_v48 }
  0x6d   :  { %1588 = vmatprep.subr.bf16.mxu1 %v1673_v51  ;;  %v1689_v5 = vpop.eup %1688 }
  0x6e   :  { %1561 = vmatpush3.bf16.msra.mxu0 %v1674_v52  ;;  %v2089_v8 = vmul.f32 %v1689_v5, %v424_v58  ;;  %v2091_v9 = vmul.f32 %v1689_v5, %v474_v61 }
  0x6f   :  { %1562 = vmatprep.subr.bf16.mxu0 %v1676_v53  ;;  %v1691_v6 = vpop.eup %1690 }
  0x70   :  { %1589 = vmatpush3.bf16.msra.mxu1 %v1675_v56  ;;  %v1693_v11 = vpop.eup %1692  ;;  %v2097_v15 = vmul.f32 %v1691_v6, %v432_v0  ;;  %v2099_v16 = vmul.f32 %v1691_v6, %v482_v2  ;;  %v535_v59 = vmul.f32 %v2089_v8, %v2028_v21  ;;  %v543_v19 = vmul.f32 %v2091_v9, %v2028_v21  ;;  %v2142_v0 = vld [vmem:[%s2241_s5] sm:$0x3] }
  0x71   :  { %1590 = vmatprep.subr.bf16.mxu1 %v1677_v62  ;;  %v2103_v17 = vmul.f32 %v1693_v11, %v420_v4  ;;  %v2116_v30 = vmul.f32 %v1693_v11, %v470_v10  ;;  %v2146_v2 = vrot.slane %v2142_v0, %v1891_v28  ;;  %v2150_v11 = vand.u32 127, %v208_v18 }
  0x72   :  { %1563 = vmatpush3.bf16.msra.mxu0 %v1678_v40  ;;  %v537_v36 = vmul.f32 %v2097_v15, %v2040_v27  ;;  %v1473_v60 = vpack.c.bf16 %v535_v59, %v2037_v26  ;;  %v545_v44 = vmul.f32 %v2099_v16, %v2040_v27  ;;  %v559_v50 = vpack.c.bf16 %v543_v19, %v543_v19 }
  0x73   :  { %v1695_v20 = vpop.eup %1694  ;;  %v534_v57 = vmul.f32 %v2103_v17, %v2050_v37  ;;  %vm1145_vm3 = vcmp.lt.s32.totalorder %v2150_v11, 8  ;;  %vm1334_vm12 = vcmp.eq.s32.totalorder %v2150_v11, 1  ;;  %vm1333_vm13 = vcmp.eq.s32.totalorder %v2150_v11, 0 }
  0x74   :  { %1591 = vmatpush3.bf16.msra.mxu1 %v1679_v7  ;;  %v1479_v21 = vpack.c.bf16 %v537_v36, %v2047_v33  ;;  %v2119_v25 = vmul.f32 %v1695_v20, %v428_v14  ;;  %1474 = vmatprep.mubr.msk.bf16.mxu0 %vm1997_vm2, %v1473_v60  ;;  %v2128_v26 = vmul.f32 %v1695_v20, %v478_v22 }
  0x75   :  { %v1476_v38 = vpack.c.bf16 %v534_v57, %v2055_v46  ;;  %v561_v27 = vpack.c.bf16 %v545_v44, %v545_v44  ;;  %v542_v33 = vmul.f32 %v2116_v30, %v2050_v37 }
  0x76   :  { %1480 = vmatprep.mubr.msk.bf16.mxu1 %vm1997_vm2, %v1479_v21  ;;  %v536_v24 = vmul.f32 %v2119_v25, %v2068_v63  ;;  %v544_v46 = vmul.f32 %v2128_v26, %v2068_v63 }
  0x77   :  { %1477 = vmatmul.mubr.msk.bf16.vlgmr.msra.gmra.mxu0 %vm1997_vm2, %v1476_v38  ;;  %v558_v29 = vpack.c.bf16 %v542_v33, %v542_v33 }
  0x78   :  { %v1482_v49 = vpack.c.bf16 %v536_v24, %v2071_v3  ;;  %1086 = vmatprep.mubr.bf16.mxu0 %v559_v50  ;;  %v560_v31 = vpack.c.bf16 %v544_v46, %v544_v46 }
  0x7a   :  { %1483 = vmatmul.mubr.msk.bf16.vlgmr.msra.gmra.mxu1 %vm1997_vm2, %v1482_v49 }
  0x7b   :  { %1134 = vmatprep.mubr.bf16.mxu1 %v561_v27 }
  0x7f   :  { %1087 = vmatmul.mubr.bf16.gmra.mxu0 %v558_v29 }
  0x82   :  { %1135 = vmatmul.mubr.bf16.gmra.mxu1 %v560_v31 }
 0x115   :  { %v1508_v35 = vpop.f32.mrf.mxu0 }
 0x117   :  { %v1536_v39 = vpop.f32.mrf.mxu1  ;;  %v1509_v45 = vpop.f32.mrf.mxu0 }
 0x118   :  { %v1510_v40 = vadd.f32 %v1509_v45, %v1508_v35 }
 0x119   :  { %v1537_v47 = vpop.f32.mrf.mxu1  ;;  %v1511_v48 = vpop.f32.mrf.mxu0 }
 0x11a   :  { %v985_v4 = vadd.f32 %v1510_v40, %v2146_v2  ;;  %v1538_v7 = vadd.f32 %v1537_v47, %v1536_v39 }
 0x11b   :  { %v1539_v37 = vpop.f32.mrf.mxu1  ;;  %v1512_v51 = vpop.f32.mrf.mxu0 }
 0x11c   :  { %v1513_v5 = vadd.f32 %v1512_v51, %v1511_v48  ;;  %v1033_v14 = vadd.f32 %v1538_v7, %v985_v4  ;;  %v1144_v4 = vcvt.s32.f32 %v2150_v11 }
 0x11d   :  { %v1540_v3 = vpop.f32.mrf.mxu1  ;;  %v1514_v52 = vpop.f32.mrf.mxu0 }
 0x11e   :  { %v988_v59 = vadd.f32 %v1513_v5, %v2146_v2  ;;  %v1541_v60 = vadd.f32 %v1540_v3, %v1539_v37 }
 0x11f   :  { %v1515_v53 = vpop.f32.mrf.mxu0  ;;  %v1542_v1 = vpop.f32.mrf.mxu1 }
 0x120   :  { %v1516_v19 = vadd.f32 %v1515_v53, %v1514_v52  ;;  %v1036_v38 = vadd.f32 %v1541_v60, %v988_v59 }
 0x121   :  { %v1517_v56 = vpop.f32.mrf.mxu0  ;;  %v1543_v58 = vpop.f32.mrf.mxu1 }
 0x122   :  { %v993_v24 = vadd.f32 %v1516_v19, %v2146_v2  ;;  %v1544_v27 = vadd.f32 %v1543_v58, %v1542_v1  ;;  %v511_v19 = vadd.f32 %v2010_v54, %v2008_v12  ;;  %v1697_v12 = vpop.eup %1696 }
 0x123   :  { %v1518_v61 = vpop.f32.mrf.mxu0  ;;  %v1545_v63 = vpop.f32.mrf.mxu1 }
 0x124   :  { %v1041_v47 = vadd.f32 %v1544_v27, %v993_v24  ;;  %v1699_v24 = vpop.eup %1698 }
 0x125   :  { %v1546_v62 = vpop.f32.mrf.mxu1 }
 0x137   :  { %v1564_v6 = vpop.f32.mrf.mxu0 }
 0x139   :  { %v1565_v10 = vpop.f32.mrf.mxu0 }
 0x13a   :  { %v1592_v36 = vpop.f32.mrf.mxu1  ;;  %v1566_v22 = vadd.f32 %v1565_v10, %v1564_v6 }
 0x13b   :  { %v1567_v20 = vpop.f32.mrf.mxu0 }
 0x13c   :  { %v1081_v57 = vadd.f32 %v1566_v22, %v1033_v14  ;;  %v1593_v44 = vpop.f32.mrf.mxu1 }
 0x13d   :  { %v1594_v21 = vadd.f32 %v1593_v44, %v1592_v36  ;;  %v1568_v50 = vpop.f32.mrf.mxu0  ;;  %v512_v36 = vadd.f32 %v511_v19, %v2116_v30 }
 0x13e   :  { %v1595_v18 = vpop.f32.mrf.mxu1  ;;  %v1569_v33 = vadd.f32 %v1568_v50, %v1567_v20 }
 0x13f   :  { %v1570_v49 = vpop.f32.mrf.mxu0  ;;  %v2155_v46 = vadd.f32 %v1594_v21, %v1081_v57  ;;  %v513_v22 = vadd.f32 %v512_v36, %v2091_v9  ;;  %v502_v57 = vadd.f32 %v2016_v55, %v2103_v17  ;;  %v1211_v9 = vmul.f32 0.6931472, %v1697_v12 }
 0x140   :  { %v1084_v29 = vadd.f32 %v1569_v33, %v1036_v38  ;;  %v1596_v31 = vpop.f32.mrf.mxu1  ;;  %v1185_v55 = vrot.slane %v2142_v0, %v1897_v32 }
 0x141   :  { %v1597_v35 = vadd.f32 %v1596_v31, %v1595_v18  ;;  %v1571_v39 = vpop.f32.mrf.mxu0  ;;  %v1146_v45 = vsel %vm1145_vm3, %v2155_v46, -1e+30  ;;  %v514_v20 = vadd.f32 %v513_v22, %v2128_v26  ;;  %v503_v44 = vadd.f32 %v502_v57, %v2089_v8 }
 0x142   :  { %v1598_v48 = vpop.f32.mrf.mxu1  ;;  %v1572_v37 = vadd.f32 %v1571_v39, %v1570_v49  ;;  %1149 = vmax.xlane.f32.xlu0 %v1146_v45  ;;  %v1223_v41 = vrot.slane %v1211_v9, %v1900_v34  ;;  %v1227_v38 = vrot.slane %v1211_v9, %v1913_v42  ;;  %v1213_v31 = vmul.f32 0.6931472, %v1699_v24  ;;  %v76_v24 = vld [vmem:[%s2239_s3] sm:$0xff]  ;;  %s1836_s3 = smov [#allocation9]  }
 0x143   :  { %v1573_v51 = vpop.f32.mrf.mxu0  ;;  %v1132_v3 = vadd.f32 %v1597_v35, %v1084_v29  ;;  %v515_v60 = vadd.f32 %v514_v20, %v2099_v16  ;;  %v504_v21 = vadd.f32 %v503_v44, %v2119_v25  ;;  %v1834_v16 = vmov 0.0   ;;  %s1382_s19 = sshll.u32 %s1836_s3, 4  ;;  %s1383_s19 = int_to_ptr.vmem [resolvable:$true] %s1382_s19 }
 0x144   :  { %v1089_v52 = vadd.f32 %v1572_v37, %v1041_v47  ;;  %v1599_v53 = vpop.f32.mrf.mxu1  ;;  %v1258_v18 = vsel %vm1256_vm9, %v1223_v41, 0.0  ;;  %v1231_v47 = vrot.slane %v1211_v9, %v1916_v43  ;;  %v1835_v22 = vmov 0   ;;  %s1780_s20 = scalar_lea.vmem %s1383_s19, 128  ;;  %p1785_p2 = scmp.lt.s32.totalorder %s1383_s19, %s1383_s19 }
 0x145   :  { %v1600_v1 = vadd.f32 %v1599_v53, %v1598_v48  ;;  %v1574_v56 = vpop.f32.mrf.mxu0  ;;  %v1147_v58 = vsel %vm1145_vm3, %v1132_v3, -1e+30  ;;  %v505_v50 = vadd.f32 %v504_v21, %v2097_v15  ;;  %v1219_v15 = vrot.slane %v1211_v9, %v1897_v32  ;;  %1615 = vset.pattern.permute.xlu0 %v1835_v22  ;;  %1614 = vset.pattern.permute.xlu1 %v1835_v22  ;;  %p1781_p1 = scmp.ne.s32.totalorder %s1383_s19, %s1780_s20  ;;  %p1786_p3 = scmp.lt.s32.totalorder %s1780_s20, %s1780_s20 }
 0x146   :  { %v1601_v61 = vpop.f32.mrf.mxu1  ;;  %1151 = vmax.xlane.f32.xlu1 %v1147_v58  ;;  %v1260_v48 = vsel %vm1256_vm9, %v1227_v38, 0.0  ;;  %v1235_v53 = vrot.slane %v1213_v31, %v1897_v32 }
 0x147   :  { %v1137_v63 = vadd.f32 %v1600_v1, %v1089_v52  ;;  %v1257_v0 = vsel %vm1256_vm9, %v1219_v15, 0.0  ;;  %v1262_v1 = vsel %vm1256_vm9, %v1231_v47, 0.0  ;;  %v1239_v61 = vrot.slane %v1213_v31, %v1900_v34  ;;  %p1787_p4 = por %p1786_p3, %p1785_p2 }
 0x148   :  { %v1602_v62 = vpop.f32.mrf.mxu1  ;;  %v1259_v35 = vadd.f32 %v1258_v18, %v1257_v0 }
 0x149   :  { %v1148_v40 = vsel %vm1145_vm3, %v1137_v63, -1e+30  ;;  %v1264_v63 = vsel %vm1256_vm9, %v1235_v53, 0.0  ;;  %p1788_p5 = pnand %p1787_p4, %p1781_p1 }
 0x14a   :  { %1153 = vmax.xlane.f32.xlu0 %v1148_v40  ;;  %v1261_v3 = vadd.f32 %v1260_v48, %v1259_v35 }
 0x1cb   :  { %v1150_v5 = vpop.xlane.xlu0 %1149 }
 0x1cc   :  { %vm1155_vm4 = vcmp.ge.f32.partialorder %v1146_v45, %v1150_v5 }
 0x1cd   :  { %v1158_v6 = vsel %vm1155_vm4, %v1144_v4, 128.0 }
 0x1ce   :  { %1161 = vmin.xlane.f32.xlu1 %v1158_v6  ;;  %v1247_v6 = vrot.slane %v1213_v31, %v1916_v43 }
 0x1cf   :  { %v1152_v7 = vpop.xlane.xlu1 %1151 }
 0x1d0   :  { %vm1156_vm5 = vcmp.ge.f32.partialorder %v1147_v58, %v1152_v7  ;;  %v1263_v58 = vadd.f32 %v1262_v1, %v1261_v3  ;;  %v1270_v34 = vsel %vm1256_vm9, %v1247_v6, 0.0 }
 0x1d1   :  { %v1159_v10 = vsel %vm1156_vm5, %v1144_v4, 128.0 }
 0x1d2   :  { %1163 = vmin.xlane.f32.xlu1 %v1159_v10  ;;  %v1265_v62 = vadd.f32 %v1264_v63, %v1263_v58 }
 0x1d3   :  { %v1154_v14 = vpop.xlane.xlu0 %1153 }
 0x1d4   :  { %vm1157_vm6 = vcmp.ge.f32.partialorder %v1148_v40, %v1154_v14  ;;  %v1243_v40 = vrot.slane %v1213_v31, %v1913_v42 }
 0x1d5   :  { %v1160_v59 = vsel %vm1157_vm6, %v1144_v4, 128.0 }
 0x1d6   :  { %1165 = vmin.xlane.f32.xlu0 %v1160_v59  ;;  %506 = vadd.xlane.f32.xlu1 %v505_v50  ;;  %v1268_v7 = vsel %vm1256_vm9, %v1243_v40, 0.0 }
 0x1da   :  { %516 = vadd.xlane.f32.xlu0 %v515_v60 }
 0x257   :  { %v1162_v54 = vpop.xlane.xlu1 %1161 }
 0x258   :  { %vm1167_vm7 = vcmp.eq.f32.partialorder %v1144_v4, %v1162_v54 }
 0x259   :  { %v1484_v30 = vsel %vm1167_vm7, 1.0, %v1834_v16 }
 0x25a   :  { %v2181_v8 = vrot.slane %v1484_v30, %v1891_v28 }
 0x25b   :  { %v1164_v17 = vpop.xlane.xlu1 %1163 }
 0x25c   :  { %vm1168_vm8 = vcmp.eq.f32.partialorder %v1144_v4, %v1164_v17 }
 0x25d   :  { %v1485_v25 = vsel %vm1168_vm8, 1.0, %v1834_v16 }
 0x25e   :  { %v1180_v13 = vsub.f32 %v1485_v25, %v2181_v8 }
 0x25f   :  { %v1166_v26 = vpop.xlane.xlu0 %1165  ;;  %v507_v20 = vpop.xlane.xlu1 %506 }
 0x260   :  { %v1186_v27 = vmul.f32 %v1185_v55, %v1180_v13  ;;  %vm1169_vm10 = vcmp.eq.f32.partialorder %v1144_v4, %v1166_v26  ;;  %v1266_v4 = vsel %vm1256_vm9, %v1239_v61, 0.0  ;;  %v508_v57 = vmul.f32 0.0009765625, %v507_v20 }
 0x261   :  { %v1486_v33 = vsel %vm1169_vm10, 1.0, %v1834_v16  ;;  %v1267_v5 = vadd.f32 %v1266_v4, %v1265_v62 }
 0x262   :  { %v1188_v49 = vmul.f32 -0.5, %v1186_v27  ;;  %v1181_v29 = vsub.f32 %v1486_v33, %v2181_v8  ;;  %v1275_v21 = vrot.slane %v508_v57, 4 }
 0x263   :  { %v1269_v59 = vadd.f32 %v1268_v7, %v1267_v5  ;;  %v517_v43 = vpop.xlane.xlu0 %516 }
 0x264   :  { %v1190_v39 = vmul.f32 %v1188_v49, %v1186_v27  ;;  %v1187_v45 = vmul.f32 %v1185_v55, %v1181_v29  ;;  %v518_v60 = vmul.f32 0.0009765625, %v517_v43  ;;  %v1276_v12 = vadd.f32 %v1275_v21, %v508_v57 }
 0x265   :  { %v1271_v42 = vadd.f32 %v1270_v34, %v1269_v59 }
 0x266   :  { %v1192_v37 = vmul.f32 1.442695, %v1190_v39  ;;  %v1189_v51 = vmul.f32 -0.5, %v1187_v45  ;;  %v1292_v44 = vrot.slane %v518_v60, 4  ;;  %v1277_v9 = vrot.slane %v1276_v12, 2 }
 0x268   :  { %1700 = vpow2.f32 %v1192_v37  ;;  %v1191_v52 = vmul.f32 %v1189_v51, %v1187_v45  ;;  %v1293_v50 = vadd.f32 %v1292_v44, %v518_v60  ;;  %v1278_v30 = vadd.f32 %v1277_v9, %v1276_v12 }
 0x26a   :  { %v1194_v56 = vmul.f32 1.442695, %v1191_v52  ;;  %v1294_v54 = vrot.slane %v1293_v50, 2  ;;  %v1279_v17 = vrot.slane %v1278_v30, 1 }
 0x26c   :  { %1702 = vpow2.f32 %v1194_v56  ;;  %v1295_v16 = vadd.f32 %v1294_v54, %v1293_v50  ;;  %v1280_v41 = vadd.f32 %v1279_v17, %v1278_v30 }
 0x26e   :  { %v1296_v55 = vrot.slane %v1295_v16, 1 }
 0x270   :  { %v1297_v15 = vadd.f32 %v1296_v55, %v1295_v16 }
 0x272   :  { %1704 = vlog2.f32 %v1297_v15 }
 0x273   :  { %1706 = vlog2.f32 %v1280_v41  ;;  %v1363_v41 = vrot.slane %v2155_v46, %v1891_v28 }
 0x275   :  { %v1701_v10 = vpop.eup %1700 }
 0x276   :  { %v1196_v14 = vsel %vm1145_vm3, %v1701_v10, 0.0 }
 0x277   :  { %1198 = vadd.xlane.f32.xlu1 %v1196_v14 }
 0x279   :  { %v1703_v19 = vpop.eup %1702 }
 0x27a   :  { %v1197_v36 = vsel %vm1145_vm3, %v1703_v19, 0.0 }
 0x27b   :  { %1200 = vadd.xlane.f32.xlu0 %v1197_v36 }
 0x27f   :  { %1272 = vadd.xlane.f32.xlu0 %v1271_v42  ;;  %v1705_v25 = vpop.eup %1704 }
 0x280   :  { %v1707_v13 = vpop.eup %1706  ;;  %v1299_v0 = vmul.f32 0.6931472, %v1705_v25 }
 0x281   :  { %v1282_v18 = vmul.f32 0.6931472, %v1707_v13 }
 0x282   :  { %v1489_v45 = vadd.f32 -2.0794415, %v1299_v0 }
 0x283   :  { %v1487_v47 = vadd.f32 -2.0794415, %v1282_v18 }
 0x300   :  { %v1199_v26 = vpop.xlane.xlu1 %1198 }
 0x301   :  { %v1202_v38 = vmul.f32 0.125, %v1199_v26 }
 0x303   :  { %v1206_v27 = vmul.f32 %v1202_v38, %v508_v57 }
 0x304   :  { %v1201_v33 = vpop.xlane.xlu0 %1200 }
 0x305   :  { %v1309_v49 = vrot.slane %v1206_v27, 4  ;;  %v1203_v29 = vmul.f32 0.125, %v1201_v33  ;;  %v1208_v31 = vmul.f32 %v1206_v27, %v76_v24 }
 0x307   :  { %v1310_v35 = vadd.f32 %v1309_v49, %v1206_v27  ;;  %v1204_v39 = vsub.f32 1.0, %v1203_v29  ;;  %1343 = vperm.xlu0 %1615, %v1208_v31  }
 0x308   :  { %v1273_v48 = vpop.xlane.xlu0 %1272 }
 0x309   :  { %v1311_v37 = vrot.slane %v1310_v35, 2  ;;  %v1205_v51 = vsel %vm521_vm0, 1.0, %v1204_v39  ;;  %v1274_v3 = vsub.f32 0.0, %v1273_v48 }
 0x30a   :  { %v1207_v52 = vmul.f32 %v1205_v51, %v518_v60 }
 0x30b   :  { %v1312_v53 = vadd.f32 %v1311_v37, %v1310_v35  ;;  %v1284_v1 = vsub.f32 %v1487_v47, %v1274_v3  ;;  %v1301_v56 = vsub.f32 %v1489_v45, %v1274_v3 }
 0x30c   :  { %v1209_v58 = vmul.f32 %v1207_v52, %v76_v24  ;;  %v1324_v10 = vrot.slane %v1207_v52, 4 }
 0x30d   :  { %v1313_v61 = vrot.slane %v1312_v53, 1  ;;  %v1488_v63 = vmul.f32 -0.1, %v1284_v1  ;;  %v1490_v62 = vmul.f32 -0.1, %v1301_v56 }
 0x30e   :  { %1337 = vperm.xlu1 %1614, %v1209_v58   ;;  %v1325_v14 = vadd.f32 %v1324_v10, %v1207_v52 }
 0x30f   :  { %v1314_v40 = vadd.f32 %v1313_v61, %v1312_v53  ;;  %v1287_v4 = vmul.f32 1.442695, %v1488_v63  ;;  %v1304_v5 = vmul.f32 1.442695, %v1490_v62 }
 0x310   :  { %v1326_v19 = vrot.slane %v1325_v14, 2 }
 0x311   :  { %v1491_v6 = vmul.f32 -100.0, %v1314_v40  ;;  %1708 = vpow2.f32 %v1287_v4 }
 0x312   :  { %1710 = vpow2.f32 %v1304_v5  ;;  %v1327_v20 = vadd.f32 %v1326_v19, %v1325_v14 }
 0x313   :  { %v1317_v7 = vmul.f32 1.442695, %v1491_v6 }
 0x314   :  { %v1328_v60 = vrot.slane %v1327_v20, 1 }
 0x315   :  { %1712 = vpow2.f32 %v1317_v7 }
 0x316   :  { %v1329_v57 = vadd.f32 %v1328_v60, %v1327_v20 }
 0x318   :  { %v1330_v21 = vmul.f32 0.5, %v1329_v57 }
 0x31e   :  { %v1709_v59 = vpop.eup %1708 }
 0x31f   :  { %v1711_v34 = vpop.eup %1710  ;;  %v1289_v36 = vadd.f32 1.0, %v1709_v59 }
 0x320   :  { %v1306_v42 = vadd.f32 1.0, %v1711_v34 }
 0x322   :  { %v1713_v22 = vpop.eup %1712  ;;  %1714 = vrcp.f32 %v1306_v42 }
 0x323   :  { %v1319_v43 = vadd.f32 1.0, %v1713_v22  ;;  %1716 = vrcp.f32 %v1289_v36 }
 0x325   :  { %1718 = vrcp.f32 %v1319_v43 }
 0x32f   :  { %v1715_v44 = vpop.eup %1714 }
 0x330   :  { %v1717_v50 = vpop.eup %1716  ;;  %v1332_v54 = vmul.f32 %v1715_v44, %v1330_v21 }
 0x332   :  { %v1719_v12 = vpop.eup %1718  ;;  %v1348_v30 = vsel %vm1334_vm12, %v1332_v54, 0.0 }
 0x333   :  { %vm1322_vm11 = vcmp.ne.f32.partialorder %v1719_v12, 0.0 }
 0x334   :  { %v1323_v9 = vsel %vm1322_vm11, %v1719_v12, 1.0 }
 0x335   :  { %v1331_v16 = vmul.f32 %v1717_v50, %v1323_v9 }
 0x337   :  { %v1349_v55 = vsel %vm1333_vm13, %v1331_v16, %v1348_v30 }
 0x338   :  { %v1356_v17 = vrot.slane %v1349_v55, %v1897_v32 }
 0x33a   :  { %v1357_v15 = vsel %vm1352_vm14, %v1356_v17, 0.0 }
 0x33b   :  { %v1358_v25 = vsel %vm1351_vm15, %v2146_v2, %v1357_v15 }
 0x33c   :  { %v1359_v13 = vsel %vm1350_vm1, %v2181_v8, %v1358_v25 }
 0x33d   :  { %v1364_v26 = vsel %vm521_vm0, %v1363_v41, %v1359_v13 }
 0x33e   :  { %1365 = vst [vmem:[#allocation9] sm:$0xff] %v1364_v26 }
 0x33f   :  { %1791 = shalt.err (!%p1788_p5)
}
 0x340   :  { %1385 = dma.vmem_to_hbm [thread:$0]  %s1383_s19, 128, %s2243_s7, [#allocation10]  }
 0x341   :  { %s1837_s23 = smov [#allocation8]  }
 0x342   :  { %s1372_s24 = sshll.u32 %s1837_s23, 4  ;;  %s1373_s24 = int_to_ptr.vmem [resolvable:$true] %s1372_s24 }
 0x343   :  { %s1800_s25 = scalar_lea.vmem %s1373_s24, 128  ;;  %p1805_p7 = scmp.lt.s32.totalorder %s1373_s24, %s1373_s24 }
 0x344   :  { %p1801_p6 = scmp.ne.s32.totalorder %s1373_s24, %s1800_s25  ;;  %p1806_p8 = scmp.lt.s32.totalorder %s1800_s25, %s1800_s25 }
 0x346   :  { %p1807_p9 = por %p1806_p8, %p1805_p7 }
 0x348   :  { %p1808_p10 = pnand %p1807_p9, %p1801_p6 }
 0x382   :  { %v1344_v32 = vpop.permute.xlu0 %1343 }
 0x389   :  { %v1338_v28 = vpop.permute.xlu1 %1337 }
 0x38a   :  { %v1340_v23 = vsel %vm1334_vm12, %v1338_v28, 0.0 }
 0x38b   :  { %v1346_v2 = vsel %vm1333_vm13, %v1344_v32, %v1340_v23 }
 0x38c   :  { %1347 = vst [vmem:[#allocation8] sm:$0xff] %v1346_v2 }
 0x38d   :  { %1811 = shalt.err (!%p1808_p10)
}
 0x38e   :  { %1375 = dma.vmem_to_hbm [thread:$0]  %s1373_s24, 128, %s2242_s6, [#allocation4]  }
 0x38f   :  { %1824 = dma.done.wait [#allocation4], 128  }
 0x390   :  { %1825 = vsyncadd [#allocation4], 4294967168 }
 0x391   :  { %1826 = dma.done.wait [#allocation10], 128  }
 0x392   :  { %1827 = vsyncadd [#allocation10], 4294967168 }
 0x393   :  { %1392 = vsyncpa [#allocation3], 1 }
 0x394   :  { %1393 = vsyncpa [#allocation6], 1 }
 0x395   :  { %1394 = vsyncpa [#allocation4], 1 }
 0x396   :  { %1395 = vsyncpa [#allocation10], 1 }

</bundles_post_ra>
